<compile_context>
chip_gen: v6e
topology: v6e:2x2x1
jax: 0.10.0
libtpu: 0.0.40
codegen_flags: <defaults>
</compile_context>

<pallas_src>
import jax
import jax.numpy as jnp
from jax.experimental import pallas as pl
from jax.experimental.pallas import tpu as pltpu

EPS = 1e-5
LANE = 128


def _round_up(x, m):
    return (x + m - 1) // m * m


def _cdiv(a, b):
    return -(-a // b)


def _choose_m_tiling(M, K_pad, Cout_pad):
    """Pick TM (lane tile over M), padded M, tile count and a VMEM estimate."""
    M_128 = _round_up(max(M, 1), LANE)
    n_tiles = max(1, _cdiv(M_128, 8 * LANE))      # tiles of up to 1024 lanes
    if M_128 > LANE:
        n_tiles = max(n_tiles, 2)                 # v7x: keep both TensorCores busy

    def est(tm):
        # double-buffered p & conv tiles + (buffered) resident weight + stats blocks + slack
        return 4 * (2 * K_pad * tm + 2 * Cout_pad * tm + 2 * Cout_pad * K_pad
                    + 4 * Cout_pad * LANE) + (1 << 20)

    TM = _round_up(_cdiv(M_128, n_tiles), LANE)
    while TM > LANE and est(TM) > (48 << 20):     # v7x has 64 MiB physical VMEM
        TM = _round_up(_cdiv(TM, 2), LANE)
    M_pad = _round_up(M_128, TM)
    n_tiles = M_pad // TM
    return TM, M_pad, n_tiles, est(TM)


def _conv_stats_kernel(w_ref, p_ref, conv_ref, sum_ref, sumsq_ref):
    # (Cout_pad, K_pad) @ (K_pad, TM) on the MXU, f32 accumulation. M on the lane axis.
    conv = jnp.dot(w_ref[...], p_ref[...], preferred_element_type=jnp.float32)
    conv_ref[...] = conv
    # Per-tile partial BN statistics (reduce over the lane axis); replicate across 128 lanes so
    # the store stays an unmasked, (8,128)-aligned block.
    s = jnp.sum(conv, axis=1, keepdims=True)
    sq = jnp.sum(conv * conv, axis=1, keepdims=True)
    sum_ref[...] = jnp.broadcast_to(s, sum_ref.shape)
    sumsq_ref[...] = jnp.broadcast_to(sq, sumsq_ref.shape)


def _bn_relu_kernel(conv_ref, scale_ref, shift_ref, out_ref):
    # Folded BN affine (scale = gamma*rsqrt(var+eps), shift = beta - mean*scale) + ReLU.
    out_ref[...] = jnp.maximum(conv_ref[...] * scale_ref[...] + shift_ref[...], 0.0)


@jax.jit
def encoder_block_forward(x, w, gamma, beta):
    """x: (N, Cin, H, W) f32; w: (Cout, Cin, 5, 5); gamma/beta: (Cout,).

    Returns (relu_bn_out, conv_out) in NCHW, matching EncoderBlock.forward(ten, out=True)
    in PyTorch training mode (batch statistics, biased variance, eps=1e-5).
    """
    N, Cin, H, W = x.shape
    Cout = w.shape[0]
    KH = KW = 5
    stride = 2
    pad = 2
    Ho = (H + 2 * pad - KH) // stride + 1
    Wo = (W + 2 * pad - KW) // stride + 1
    M = N * Ho * Wo
    K = Cin * KH * KW

    K_pad = _round_up(K, LANE)
    Cout_pad = _round_up(Cout, 8)                 # sublane-aligned only (no 16x lane padding)
    TM, M_pad, n_tiles, vmem_est = _choose_m_tiling(M, K_pad, Cout_pad)
    vmem_limit = min(max(int(vmem_est * 1.25), 32 << 20), 64 << 20)

    # --- glue: im2col built directly in (K, M) layout ---------------------------------------
    # Only the (input-sized) padded tensor is transposed; the 25 tap slices stack straight into
    # (Cin, 25, N, Ho, Wo) -> (K, M) with K ordered (cin, kh, kw) to match the OIHW weight.
    xp = jnp.pad(x, ((0, 0), (0, 0), (pad, pad), (pad, pad)))
    xt = jnp.transpose(xp, (1, 0, 2, 3))          # (Cin, N, Hp, Wp)
    taps = [xt[:, :, kh:kh + stride * Ho:stride, kw:kw + stride * Wo:stride]
            for kh in range(KH) for kw in range(KW)]
    p_t = jnp.stack(taps, axis=1).reshape(K, M)   # (Cin*KH*KW, N*Ho*Wo)
    p_t = jnp.pad(p_t, ((0, K_pad - K), (0, M_pad - M)))

    # PyTorch OIHW weight -> (Cout_pad, K_pad); tiny, stays resident in VMEM.
    w_t = jnp.pad(w.reshape(Cout, K), ((0, Cout_pad - Cout), (0, K_pad - K)))

    # --- pass 1: tiled conv matmul + per-tile partial BN statistics --------------------------
    conv_pad, sums, sumsqs = pl.pallas_call(
        _conv_stats_kernel,
        out_shape=(
            jax.ShapeDtypeStruct((Cout_pad, M_pad), jnp.float32),
            jax.ShapeDtypeStruct((Cout_pad, n_tiles * LANE), jnp.float32),
            jax.ShapeDtypeStruct((Cout_pad, n_tiles * LANE), jnp.float32),
        ),
        grid_spec=pltpu.PrefetchScalarGridSpec(
            num_scalar_prefetch=0,
            grid=(n_tiles,),
            in_specs=[
                pl.BlockSpec((Cout_pad, K_pad), lambda i: (0, 0)),   # resident weight
                pl.BlockSpec((K_pad, TM), lambda i: (0, i)),         # patch tile
            ],
            out_specs=[
                pl.BlockSpec((Cout_pad, TM), lambda i: (0, i)),
                pl.BlockSpec((Cout_pad, LANE), lambda i: (0, i)),
                pl.BlockSpec((Cout_pad, LANE), lambda i: (0, i)),
            ],
        ),
        compiler_params=pltpu.CompilerParams(
            dimension_semantics=("parallel",), vmem_limit_bytes=vmem_limit),
    )(w_t, p_t)

    # --- tiny JAX finalize of batch statistics ------------------------------------------------
    total_sum = jnp.sum(sums.reshape(Cout_pad, n_tiles, LANE)[:, :, 0], axis=1)
    total_sq = jnp.sum(sumsqs.reshape(Cout_pad, n_tiles, LANE)[:, :, 0], axis=1)
    count = jnp.float32(M)                        # padded columns are all-zero -> contribute 0
    mean = total_sum / count
    var = jnp.maximum(total_sq / count - mean * mean, 0.0)   # biased variance (training mode)
    inv_std = jax.lax.rsqrt(var + EPS)
    gamma_pad = jnp.pad(gamma, (0, Cout_pad - Cout))
    beta_pad = jnp.pad(beta, (0, Cout_pad - Cout))
    scale = (gamma_pad * inv_std).reshape(Cout_pad, 1)
    shift = (beta_pad - mean * gamma_pad * inv_std).reshape(Cout_pad, 1)

    # --- pass 2: fused BN affine + ReLU over conv tiles ---------------------------------------
    relu_pad = pl.pallas_call(
        _bn_relu_kernel,
        out_shape=jax.ShapeDtypeStruct((Cout_pad, M_pad), jnp.float32),
        grid_spec=pltpu.PrefetchScalarGridSpec(
            num_scalar_prefetch=0,
            grid=(n_tiles,),
            in_specs=[
                pl.BlockSpec((Cout_pad, TM), lambda i: (0, i)),
                pl.BlockSpec((Cout_pad, 1), lambda i: (0, 0)),
                pl.BlockSpec((Cout_pad, 1), lambda i: (0, 0)),
            ],
            out_specs=pl.BlockSpec((Cout_pad, TM), lambda i: (0, i)),
        ),
        compiler_params=pltpu.CompilerParams(
            dimension_semantics=("parallel",), vmem_limit_bytes=vmem_limit),
    )(conv_pad, scale, shift)

    # Channel-major kernel layout -> NCHW is just a leading-axis permute (cheap).
    conv_out = conv_pad[:Cout, :M].reshape(Cout, N, Ho, Wo).transpose(1, 0, 2, 3)
    relu_out = relu_pad[:Cout, :M].reshape(Cout, N, Ho, Wo).transpose(1, 0, 2, 3)
    return relu_out, conv_out


def _reference(x, w, gamma, beta):
    conv = jax.lax.conv_general_dilated(
        x, w, window_strides=(2, 2), padding=((2, 2), (2, 2)),
        dimension_numbers=("NCHW", "OIHW", "NCHW"))
    mean = jnp.mean(conv, axis=(0, 2, 3), keepdims=True)
    var = jnp.mean((conv - mean) ** 2, axis=(0, 2, 3), keepdims=True)
    y = (conv - mean) * jax.lax.rsqrt(var + EPS)
    y = y * gamma.reshape(1, -1, 1, 1) + beta.reshape(1, -1, 1, 1)
    return jnp.maximum(y, 0.0), conv


if __name__ == "__main__":
    # small shapes consistent with the module: batch=2, channel_in=4, channel_out=8, spatial=16
    N, Cin, Cout, H, W = 2, 4, 8, 16, 16

    key = jax.random.PRNGKey(0)
    kx, kw, kg, kb = jax.random.split(key, 4)
    x = jax.random.normal(kx, (N, Cin, H, W), dtype=jnp.float32)
    # deterministic synthetic parameters (shapes from nn.Conv2d / nn.BatchNorm2d)
    w = jax.random.normal(kw, (Cout, Cin, 5, 5), dtype=jnp.float32) * 0.1
    gamma = 1.0 + 0.1 * jax.random.normal(kg, (Cout,), dtype=jnp.float32)
    beta = 0.1 * jax.random.normal(kb, (Cout,), dtype=jnp.float32)

    relu_out, conv_out = encoder_block_forward(x, w, gamma, beta)
    jax.block_until_ready(relu_out)
    jax.block_until_ready(conv_out)

    # sanity check against a pure-JAX reference of the same math
    ref_relu, ref_conv = _reference(x, w, gamma, beta)
    assert jnp.allclose(conv_out, ref_conv, atol=1e-4, rtol=1e-4), "conv mismatch"
    assert jnp.allclose(relu_out, ref_relu, atol=1e-4, rtol=1e-4), "bn+relu mismatch"

    print("KERNEL_OK")
</pallas_src>

<mosaic_0001>
module attributes {stable_mosaic.version = 11 : i64} {
  func.func @_conv_stats_kernel(%arg0: i32, %arg1: memref<8x128xf32, #tpu.memory_space<vmem>>, %arg2: memref<128x128xf32, #tpu.memory_space<vmem>>, %arg3: memref<8x128xf32, #tpu.memory_space<vmem>>, %arg4: memref<8x128xf32, #tpu.memory_space<vmem>>, %arg5: memref<8x128xf32, #tpu.memory_space<vmem>>) attributes {dimension_semantics = [#tpu.dimension_semantics<parallel>], iteration_bounds = array<i64: 1>, scalar_prefetch = 0 : i64, scratch_operands = 0 : i64, tpu.core_type = #tpu.core_type<tc>, window_params = [{pipeline_mode = #tpu.pipeline_mode<synchronous>, transform_indices = @transform_0, window_bounds = array<i64: 8, 128>}, {transform_indices = @transform_1, window_bounds = array<i64: 128, 128>}, {transform_indices = @transform_2, window_bounds = array<i64: 8, 128>}, {transform_indices = @transform_3, window_bounds = array<i64: 8, 128>}, {transform_indices = @transform_4, window_bounds = array<i64: 8, 128>}]} {
    %c0 = arith.constant 0 : index
    %c0_0 = arith.constant 0 : index
    %0 = vector.load %arg1[%c0, %c0_0] : memref<8x128xf32, #tpu.memory_space<vmem>>, vector<8x128xf32>
    %c0_1 = arith.constant 0 : index
    %c0_2 = arith.constant 0 : index
    %1 = vector.load %arg2[%c0_1, %c0_2] : memref<128x128xf32, #tpu.memory_space<vmem>>, vector<128x128xf32>
    %cst = arith.constant dense<0.000000e+00> : vector<8x128xf32>
    %2 = tpu.matmul %0, %1, %cst {dimension_numbers = #tpu.dot_dimension_numbers<[1], [0], [0], [1], [0, 0, 1, 1], [], []>} : vector<8x128xf32>, vector<128x128xf32>, vector<8x128xf32> -> vector<8x128xf32>
    %c0_3 = arith.constant 0 : index
    %c0_4 = arith.constant 0 : index
    %3 = vector.load %arg3[%c0_3, %c0_4] : memref<8x128xf32, #tpu.memory_space<vmem>>, vector<8x128xf32>
    tpu.vector_store %arg3[%c0_3, %c0_4], %2 {strides = array<i32>} : memref<8x128xf32, #tpu.memory_space<vmem>>, vector<8x128xf32>,
    %cst_5 = arith.constant dense<0.000000e+00> : vector<8xf32>
    %4 = vector.multi_reduction <add>, %2, %cst_5 [1] : vector<8x128xf32> to vector<8xf32>
    %5 = vector.shape_cast %4 : vector<8xf32> to vector<8x1xf32>
    %6 = arith.mulf %2, %2 : vector<8x128xf32>
    %cst_6 = arith.constant dense<0.000000e+00> : vector<8xf32>
    %7 = vector.multi_reduction <add>, %6, %cst_6 [1] : vector<8x128xf32> to vector<8xf32>
    %8 = vector.shape_cast %7 : vector<8xf32> to vector<8x1xf32>
    %9 = vector.shape_cast %5 : vector<8x1xf32> to vector<8x1xf32>
    %10 = vector.broadcast %9 : vector<8x1xf32> to vector<8x128xf32>
    %c0_7 = arith.constant 0 : index
    %c0_8 = arith.constant 0 : index
    %11 = vector.load %arg4[%c0_7, %c0_8] : memref<8x128xf32, #tpu.memory_space<vmem>>, vector<8x128xf32>
    tpu.vector_store %arg4[%c0_7, %c0_8], %10 {strides = array<i32>} : memref<8x128xf32, #tpu.memory_space<vmem>>, vector<8x128xf32>,
    %12 = vector.shape_cast %8 : vector<8x1xf32> to vector<8x1xf32>
    %13 = vector.broadcast %12 : vector<8x1xf32> to vector<8x128xf32>
    %c0_9 = arith.constant 0 : index
    %c0_10 = arith.constant 0 : index
    %14 = vector.load %arg5[%c0_9, %c0_10] : memref<8x128xf32, #tpu.memory_space<vmem>>, vector<8x128xf32>
    tpu.vector_store %arg5[%c0_9, %c0_10], %13 {strides = array<i32>} : memref<8x128xf32, #tpu.memory_space<vmem>>, vector<8x128xf32>,
    return
  }
  func.func @transform_0(%arg0: i32) -> (i32, i32) {
    %c0_i32 = arith.constant 0 : i32
    %c0_i32_0 = arith.constant 0 : i32
    %c0_i32_1 = arith.constant 0 : i32
    return %c0_i32, %c0_i32_0 : i32, i32
  }
  func.func @transform_1(%arg0: i32) -> (i32, i32) {
    %c0_i32 = arith.constant 0 : i32
    %c0_i32_0 = arith.constant 0 : i32
    return %c0_i32, %arg0 : i32, i32
  }
  func.func @transform_2(%arg0: i32) -> (i32, i32) {
    %c0_i32 = arith.constant 0 : i32
    %c0_i32_0 = arith.constant 0 : i32
    return %c0_i32, %arg0 : i32, i32
  }
  func.func @transform_3(%arg0: i32) -> (i32, i32) {
    %c0_i32 = arith.constant 0 : i32
    %c0_i32_0 = arith.constant 0 : i32
    return %c0_i32, %arg0 : i32, i32
  }
  func.func @transform_4(%arg0: i32) -> (i32, i32) {
    %c0_i32 = arith.constant 0 : i32
    %c0_i32_0 = arith.constant 0 : i32
    return %c0_i32, %arg0 : i32, i32
  }
}

module attributes {stable_mosaic.version = 11 : i64} {
  func.func @_bn_relu_kernel(%arg0: i32, %arg1: memref<8x128xf32, #tpu.memory_space<vmem>>, %arg2: memref<8x1xf32, #tpu.memory_space<vmem>>, %arg3: memref<8x1xf32, #tpu.memory_space<vmem>>, %arg4: memref<8x128xf32, #tpu.memory_space<vmem>>) attributes {dimension_semantics = [#tpu.dimension_semantics<parallel>], iteration_bounds = array<i64: 1>, scalar_prefetch = 0 : i64, scratch_operands = 0 : i64, tpu.core_type = #tpu.core_type<tc>, window_params = [{transform_indices = @transform_0, window_bounds = array<i64: 8, 128>}, {pipeline_mode = #tpu.pipeline_mode<synchronous>, transform_indices = @transform_1, window_bounds = array<i64: 8, 1>}, {pipeline_mode = #tpu.pipeline_mode<synchronous>, transform_indices = @transform_2, window_bounds = array<i64: 8, 1>}, {transform_indices = @transform_3, window_bounds = array<i64: 8, 128>}]} {
    %c0 = arith.constant 0 : index
    %c0_0 = arith.constant 0 : index
    %0 = vector.load %arg1[%c0, %c0_0] : memref<8x128xf32, #tpu.memory_space<vmem>>, vector<8x128xf32>
    %c0_1 = arith.constant 0 : index
    %c0_2 = arith.constant 0 : index
    %1 = vector.load %arg2[%c0_1, %c0_2] : memref<8x1xf32, #tpu.memory_space<vmem>>, vector<8x1xf32>
    %2 = vector.broadcast %1 : vector<8x1xf32> to vector<8x128xf32>
    %3 = arith.mulf %0, %2 : vector<8x128xf32>
    %c0_3 = arith.constant 0 : index
    %c0_4 = arith.constant 0 : index
    %4 = vector.load %arg3[%c0_3, %c0_4] : memref<8x1xf32, #tpu.memory_space<vmem>>, vector<8x1xf32>
    %5 = vector.broadcast %4 : vector<8x1xf32> to vector<8x128xf32>
    %6 = arith.addf %3, %5 : vector<8x128xf32>
    %cst = arith.constant 0.000000e+00 : f32
    %7 = vector.broadcast %cst : f32 to vector<8x128xf32>
    %8 = arith.maximumf %6, %7 : vector<8x128xf32>
    %c0_5 = arith.constant 0 : index
    %c0_6 = arith.constant 0 : index
    %9 = vector.load %arg4[%c0_5, %c0_6] : memref<8x128xf32, #tpu.memory_space<vmem>>, vector<8x128xf32>
    tpu.vector_store %arg4[%c0_5, %c0_6], %8 {strides = array<i32>} : memref<8x128xf32, #tpu.memory_space<vmem>>, vector<8x128xf32>,
    return
  }
  func.func @transform_0(%arg0: i32) -> (i32, i32) {
    %c0_i32 = arith.constant 0 : i32
    %c0_i32_0 = arith.constant 0 : i32
    return %c0_i32, %arg0 : i32, i32
  }
  func.func @transform_1(%arg0: i32) -> (i32, i32) {
    %c0_i32 = arith.constant 0 : i32
    %c0_i32_0 = arith.constant 0 : i32
    %c0_i32_1 = arith.constant 0 : i32
    return %c0_i32, %c0_i32_0 : i32, i32
  }
  func.func @transform_2(%arg0: i32) -> (i32, i32) {
    %c0_i32 = arith.constant 0 : i32
    %c0_i32_0 = arith.constant 0 : i32
    %c0_i32_1 = arith.constant 0 : i32
    return %c0_i32, %c0_i32_0 : i32, i32
  }
  func.func @transform_3(%arg0: i32) -> (i32, i32) {
    %c0_i32 = arith.constant 0 : i32
    %c0_i32_0 = arith.constant 0 : i32
    return %c0_i32, %arg0 : i32, i32
  }
}

</mosaic_0001>

<bundles_post_ra>
// kernel: encoder_block_forward.3
= control target key start
LH: loop header
LB: loop body
LE: loop exit
PB: predicated region body
PF: predicated region fallthrough
CT: control target
= control target key end

     0   :  { %v37_v0 = vmov 0   ;;  %s70_s1 = inlined_call_operand.vmem [shape: f32[8,1], index: 1, kind: input, shape index: {}]   ;;  %s71_s2 = inlined_call_operand.vmem [shape: f32[8,1], index: 2, kind: input, shape index: {}]   ;;  %s72_s0 = inlined_call_operand.vmem [shape: f32[8,128], index: 0, kind: input, shape index: {}]   ;;  %s73_s3 = inlined_call_operand.vmem [shape: f32[8,128], index: 3, kind: output, shape index: {}]  }
   0x1   :  { %36 = vset.pattern.permute.xlu0 %v37_v0  ;;  %v15_v1 = vld [vmem:[%s70_s1] sm:$0xff] }
   0x2   :  { %18 = vperm.xlu0 %36, %v15_v1   ;;  %v22_v2 = vld [vmem:[%s71_s2] sm:$0xff] }
   0x3   :  { %v14_v4 = vld [vmem:[%s72_s0] sm:$0xff] }
   0x6   :  { %25 = vperm.xlu0 %36, %v22_v2  }
  0x7d   :  { %v19_v3 = vpop.permute.xlu0 %18 }
  0x7e   :  { %v21_v5 = vmul.f32 %v19_v3, %v14_v4 }
  0x81   :  { %v26_v6 = vpop.permute.xlu0 %25 }
  0x82   :  { %v28_v7 = vadd.f32 %v26_v6, %v21_v5 }
  0x84   :  { %v29_v8 = vmax.f32 %v28_v7, 0.0 }
  0x86   :  { %30 = vst [vmem:[%s73_s3] sm:$0xff] %v29_v8 }

// kernel: encoder_block_forward.2
= control target key start
LH: loop header
LB: loop body
LE: loop exit
PB: predicated region body
PF: predicated region fallthrough
CT: control target
= control target key end

     0   :  { %v175_v0 = vmov 0.0   ;;  %vm176_vm0 = vmmov 0   ;;  %s262_s1 = inlined_call_operand.vmem [shape: f32[128,128], index: 1, kind: input, shape index: {}]   ;;  %s263_s0 = inlined_call_operand.vmem [shape: f32[8,128], index: 0, kind: input, shape index: {}]   ;;  %s264_s2 = inlined_call_operand.vmem [shape: f32[8,128], index: 2, kind: output, shape index: {0}]   ;;  %s265_s3 = inlined_call_operand.vmem [shape: f32[8,128], index: 3, kind: output, shape index: {1}]   ;;  %s266_s4 = inlined_call_operand.vmem [shape: f32[8,128], index: 4, kind: output, shape index: {2}]  }
   0x1   :  { %138 = vmatprep.subr.mxu0 %v175_v0  ;;  %v30_v1 = vld [vmem:[%s262_s1 + $0x78] sm:$0xff]  ;;  %v29_v2 = vld [vmem:[%s262_s1 + $0x70] sm:$0xff]  ;;  %170 = vmatprep.mubr.msk.f32.mxu0 %vm176_vm0, %v175_v0  ;;  %v28_v3 = vld [vmem:[%s262_s1 + $0x68] sm:$0xff] }
   0x2   :  { %139 = vmatpush3.msra.mxu0 %v30_v1  ;;  %v27_v4 = vld [vmem:[%s262_s1 + $0x60] sm:$0xff]  ;;  %v26_v5 = vld [vmem:[%s262_s1 + $0x58] sm:$0xff]  ;;  %v25_v6 = vld [vmem:[%s262_s1 + $0x50] sm:$0xff] }
   0x3   :  { %140 = vmatprep.subr.mxu0 %v175_v0  ;;  %v24_v7 = vld [vmem:[%s262_s1 + $0x48] sm:$0xff]  ;;  %v23_v8 = vld [vmem:[%s262_s1 + $0x40] sm:$0xff]  ;;  %v22_v9 = vld [vmem:[%s262_s1 + $0x38] sm:$0xff] }
   0x4   :  { %141 = vmatpush3.msra.mxu0 %v29_v2  ;;  %v21_v10 = vld [vmem:[%s262_s1 + $0x30] sm:$0xff]  ;;  %v20_v11 = vld [vmem:[%s262_s1 + $0x28] sm:$0xff]  ;;  %v19_v12 = vld [vmem:[%s262_s1 + $0x20] sm:$0xff] }
   0x5   :  { %142 = vmatprep.subr.mxu0 %v175_v0  ;;  %v18_v13 = vld [vmem:[%s262_s1 + $0x18] sm:$0xff]  ;;  %v17_v14 = vld [vmem:[%s262_s1 + $0x10] sm:$0xff]  ;;  %v16_v15 = vld [vmem:[%s262_s1 + $0x8] sm:$0xff] }
   0x6   :  { %143 = vmatpush3.msra.mxu0 %v28_v3  ;;  %v15_v16 = vld [vmem:[%s262_s1] sm:$0xff] }
   0x7   :  { %144 = vmatprep.subr.mxu0 %v175_v0  ;;  %v14_v17 = vld [vmem:[%s263_s0] sm:$0xff] }
   0x8   :  { %145 = vmatpush3.msra.mxu0 %v27_v4 }
   0x9   :  { %146 = vmatprep.subr.mxu0 %v175_v0 }
   0xa   :  { %147 = vmatpush3.msra.mxu0 %v26_v5 }
   0xb   :  { %148 = vmatprep.subr.mxu0 %v175_v0 }
   0xc   :  { %149 = vmatpush3.msra.mxu0 %v25_v6 }
   0xd   :  { %150 = vmatprep.subr.mxu0 %v175_v0 }
   0xe   :  { %151 = vmatpush3.msra.mxu0 %v24_v7 }
   0xf   :  { %152 = vmatprep.subr.mxu0 %v175_v0 }
  0x10   :  { %153 = vmatpush3.msra.mxu0 %v23_v8 }
  0x11   :  { %154 = vmatprep.subr.mxu0 %v175_v0 }
  0x12   :  { %155 = vmatpush3.msra.mxu0 %v22_v9 }
  0x13   :  { %156 = vmatprep.subr.mxu0 %v175_v0 }
  0x14   :  { %157 = vmatpush3.msra.mxu0 %v21_v10 }
  0x15   :  { %158 = vmatprep.subr.mxu0 %v175_v0 }
  0x16   :  { %159 = vmatpush3.msra.mxu0 %v20_v11 }
  0x17   :  { %160 = vmatprep.subr.mxu0 %v175_v0 }
  0x18   :  { %161 = vmatpush3.msra.mxu0 %v19_v12 }
  0x19   :  { %162 = vmatprep.subr.mxu0 %v175_v0 }
  0x1a   :  { %163 = vmatpush3.msra.mxu0 %v18_v13 }
  0x1b   :  { %164 = vmatprep.subr.mxu0 %v175_v0 }
  0x1c   :  { %165 = vmatpush3.msra.mxu0 %v17_v14 }
  0x1d   :  { %166 = vmatprep.subr.mxu0 %v175_v0 }
  0x1e   :  { %167 = vmatpush3.msra.mxu0 %v16_v15 }
  0x1f   :  { %168 = vmatprep.subr.mxu0 %v175_v0 }
  0x20   :  { %169 = vmatpush3.msra.mxu0 %v15_v16 }
  0x21   :  { %171 = vmatmul.mubr.f32.vlgmr.msra.gmra.mxu0 %v14_v17 }
  0xe1   :  { %v97_v18 = vpop.f32.mrf.mxu0 }
  0xe2   :  { %101 = vst [vmem:[%s264_s2] sm:$0xff] %v97_v18  ;;  %102 = vadd.xlane.f32.xlu0 %v97_v18  ;;  %v104_v20 = vmul.f32 %v97_v18, %v97_v18 }
  0xe3   :  { %v172_v19 = vpop.f32.mrf.mxu0 }
  0xe6   :  { %105 = vadd.xlane.f32.xlu0 %v104_v20 }
 0x16b   :  { %v103_v21 = vpop.xlane.xlu0 %102 }
 0x16c   :  { %107 = vst [vmem:[%s265_s3] sm:$0xff] %v103_v21 }
 0x16f   :  { %v106_v22 = vpop.xlane.xlu0 %105 }
 0x170   :  { %108 = vst [vmem:[%s266_s4] sm:$0xff] %v106_v22 }

</bundles_post_ra>
